<compile_context>
chip_gen: v7x
topology: tpu7x:2x2x1
jax: 0.10.0
libtpu: 0.0.40
codegen_flags: <defaults>
</compile_context>

<pallas_src>
import jax
import jax.numpy as jnp
from jax import lax
from jax.experimental import pallas as pl
from jax.experimental.pallas import tpu as pltpu

EXPANSION = 4
EPS = 1e-5


# --------------------------- small helpers -----------------------------------

def _pick_tile(m):
    """Largest row tile from MXU/pipeline-friendly candidates that divides m
    and still gives >= 2 grid steps (so HBM<->VMEM double-buffering kicks in)."""
    for c in (1024, 512, 256, 128, 64, 32, 16, 8):
        if m % c == 0 and m // c >= 2:
            return c
    return m


def _cparams(*sem):
    # 48 MiB scoped VMEM: above the 16/32 MiB defaults, below v7x's 64 MiB
    # physical per-TC budget.  "parallel" axes let megacore shard the grid.
    return pltpu.CompilerParams(dimension_semantics=tuple(sem),
                                vmem_limit_bytes=48 * 1024 * 1024)


def _fold_bn(gamma, beta, mean, var):
    scale = gamma / jnp.sqrt(var + EPS)
    bias = beta - mean * scale
    return (scale.reshape(1, -1).astype(jnp.float32),
            bias.reshape(1, -1).astype(jnp.float32))


# --------------------------- Pallas kernels -----------------------------------

def k_conv1x1_bn_relu(x_ref, w_ref, sc_ref, bi_ref, o_ref):
    # x: (TM, Cin), w: (Cin, Cout), sc/bi: (1, Cout)
    y = jnp.dot(x_ref[...], w_ref[...], preferred_element_type=jnp.float32)
    y = y * sc_ref[...] + bi_ref[...]
    o_ref[...] = jnp.maximum(y, 0.0).astype(o_ref.dtype)


def k_conv3x3_bn_relu(x_ref, w_ref, sc_ref, bi_ref, o_ref, xpad_ref, acc_ref):
    # grid = (N, 3); axis 1 (kernel row dy) is the reduction axis.
    # x_ref:   (1, H, W, C)      resident across dy (same block index)
    # w_ref:   (1, 3, C, Cout)   one kernel row of weights per grid step
    # xpad_ref:(H+2, W+2, C)     zero-padded input tile (VMEM scratch)
    # acc_ref: (H*W, Cout) f32   accumulator (VMEM scratch)
    dy = pl.program_id(1)
    Hp, Wp, C = xpad_ref.shape
    H, W = Hp - 2, Wp - 2

    @pl.when(dy == 0)
    def _():
        xpad_ref[...] = jnp.zeros_like(xpad_ref)
        xpad_ref[1:H + 1, 1:W + 1, :] = x_ref[0]
        acc_ref[...] = jnp.zeros_like(acc_ref)

    # Rows [dy, dy+H) of the padded tile; dynamic offset only on the outer dim.
    rows = xpad_ref[pl.ds(dy, H), :, :]                      # (H, W+2, C)
    for dx in range(3):                                      # static column taps
        patch = rows[:, dx:dx + W, :].reshape(H * W, C)      # (H*W, C)
        acc_ref[...] += jnp.dot(patch, w_ref[0, dx],
                                preferred_element_type=jnp.float32)

    @pl.when(dy == 2)
    def _():
        y = acc_ref[...] * sc_ref[...] + bi_ref[...]
        o_ref[...] = jnp.maximum(y, 0.0).reshape(o_ref.shape).astype(o_ref.dtype)


def k_tail_pool_conv_bn_ds_add_relu(h2_ref, x_ref, w3_ref, sc3_ref, bi3_ref,
                                    wds_ref, scds_ref, bids_ref, o_ref):
    # h2_ref: (1, Ho, s, Wo, s, P)   main path (pre-pool), split-dims view
    # x_ref:  (1, Ho, s, Wo, s, Cin) block input (for the downsample branch)
    # Fuses: avgpool + conv3 + bn3 + [avgpool + conv_ds + bn_ds] + add + relu.
    _, Ho, s, Wo, _, P = h2_ref.shape
    Cin = x_ref.shape[-1]
    Cout = o_ref.shape[-1]
    cd = w3_ref.dtype

    pooled = jnp.mean(h2_ref[0].astype(jnp.float32), axis=(1, 3))     # (Ho,Wo,P)
    y = jnp.dot(pooled.reshape(Ho * Wo, P).astype(cd), w3_ref[...],
                preferred_element_type=jnp.float32)
    y = y * sc3_ref[...] + bi3_ref[...]

    xp = jnp.mean(x_ref[0].astype(jnp.float32), axis=(1, 3))          # (Ho,Wo,Cin)
    idt = jnp.dot(xp.reshape(Ho * Wo, Cin).astype(cd), wds_ref[...],
                  preferred_element_type=jnp.float32)
    idt = idt * scds_ref[...] + bids_ref[...]

    out = jnp.maximum(y + idt, 0.0)
    o_ref[...] = out.reshape(1, Ho, Wo, Cout).astype(o_ref.dtype)


def k_tail_conv_bn_add_relu(h2_ref, x_ref, w3_ref, sc3_ref, bi3_ref, o_ref):
    # No-downsample case: stride == 1 and inplanes == planes*4; identity = x.
    _, H, W, P = h2_ref.shape
    Cout = o_ref.shape[-1]
    h = h2_ref[0].reshape(H * W, P)
    y = jnp.dot(h, w3_ref[...], preferred_element_type=jnp.float32)
    y = y * sc3_ref[...] + bi3_ref[...]
    idt = x_ref[0].reshape(H * W, Cout).astype(jnp.float32)
    out = jnp.maximum(y + idt, 0.0)
    o_ref[...] = out.reshape(1, H, W, Cout).astype(o_ref.dtype)


# --------------------------- wrapper -------------------------------------------

def bottleneck_forward(x_nchw, params, stride, *, compute_dtype=jnp.float32):
    N, Cin, H, W = x_nchw.shape
    planes = params['w1'].shape[1]
    Cout = planes * EXPANSION
    s = stride
    Ho, Wo = H // s, W // s
    cd = compute_dtype

    # NCHW -> NHWC at the module boundary (unavoidable layout conversion).
    x = jnp.transpose(x_nchw, (0, 2, 3, 1)).astype(cd)

    M = N * H * W
    TM = _pick_tile(M)
    w1 = params['w1'].astype(cd)

    # ---- conv1 (1x1) + bn1 + relu ------------------------------------------
    # NOTE: real CLIP channel counts are >=64/256; tiny test channels underfill
    # the MXU lanes but the tiling pattern is the production one.
    h1 = pl.pallas_call(
        k_conv1x1_bn_relu,
        grid=(M // TM,),
        in_specs=[pl.BlockSpec((TM, Cin), lambda i: (i, 0)),
                  pl.BlockSpec((Cin, planes), lambda i: (0, 0)),
                  pl.BlockSpec((1, planes), lambda i: (0, 0)),
                  pl.BlockSpec((1, planes), lambda i: (0, 0))],
        out_specs=pl.BlockSpec((TM, planes), lambda i: (i, 0)),
        out_shape=jax.ShapeDtypeStruct((M, planes), cd),
        compiler_params=_cparams("parallel"),
        cost_estimate=pl.CostEstimate(
            flops=2 * M * Cin * planes, transcendentals=0,
            bytes_accessed=4 * (M * Cin + Cin * planes + M * planes)),
    )(x.reshape(M, Cin), w1, params['sc1'], params['bi1'])
    h1 = h1.reshape(N, H, W, planes)

    # ---- conv2 (3x3, pad=1) + bn2 + relu ------------------------------------
    w2 = params['w2'].astype(cd)                      # (3, 3, planes, planes)
    h2 = pl.pallas_call(
        k_conv3x3_bn_relu,
        grid=(N, 3),
        in_specs=[pl.BlockSpec((1, H, W, planes), lambda n, r: (n, 0, 0, 0)),
                  pl.BlockSpec((1, 3, planes, planes), lambda n, r: (r, 0, 0, 0)),
                  pl.BlockSpec((1, planes), lambda n, r: (0, 0)),
                  pl.BlockSpec((1, planes), lambda n, r: (0, 0))],
        out_specs=pl.BlockSpec((1, H, W, planes), lambda n, r: (n, 0, 0, 0)),
        out_shape=jax.ShapeDtypeStruct((N, H, W, planes), cd),
        scratch_shapes=[pltpu.VMEM((H + 2, W + 2, planes), cd),
                        pltpu.VMEM((H * W, planes), jnp.float32)],
        compiler_params=_cparams("parallel", "arbitrary"),
        cost_estimate=pl.CostEstimate(
            flops=2 * 9 * N * H * W * planes * planes, transcendentals=0,
            bytes_accessed=4 * (2 * N * H * W * planes + 9 * planes * planes)),
    )(h1, w2, params['sc2'], params['bi2'])

    # ---- tail: avgpool + conv3 + bn3 (+ fused downsample) + add + relu ------
    w3 = params['w3'].astype(cd)
    if 'w_ds' in params:
        # Free split-dims reshape (no data movement, no transpose): pooling
        # windows become reducible axes inside the kernel.
        h2_p = h2.reshape(N, Ho, s, Wo, s, planes)
        x_p = x.reshape(N, Ho, s, Wo, s, Cin)
        w_ds = params['w_ds'].astype(cd)
        out = pl.pallas_call(
            k_tail_pool_conv_bn_ds_add_relu,
            grid=(N,),
            in_specs=[pl.BlockSpec((1, Ho, s, Wo, s, planes),
                                   lambda n: (n, 0, 0, 0, 0, 0)),
                      pl.BlockSpec((1, Ho, s, Wo, s, Cin),
                                   lambda n: (n, 0, 0, 0, 0, 0)),
                      pl.BlockSpec((planes, Cout), lambda n: (0, 0)),
                      pl.BlockSpec((1, Cout), lambda n: (0, 0)),
                      pl.BlockSpec((1, Cout), lambda n: (0, 0)),
                      pl.BlockSpec((Cin, Cout), lambda n: (0, 0)),
                      pl.BlockSpec((1, Cout), lambda n: (0, 0)),
                      pl.BlockSpec((1, Cout), lambda n: (0, 0))],
            out_specs=pl.BlockSpec((1, Ho, Wo, Cout), lambda n: (n, 0, 0, 0)),
            out_shape=jax.ShapeDtypeStruct((N, Ho, Wo, Cout), jnp.float32),
            compiler_params=_cparams("parallel"),
            cost_estimate=pl.CostEstimate(
                flops=2 * N * Ho * Wo * (planes + Cin) * Cout, transcendentals=0,
                bytes_accessed=4 * (N * H * W * (planes + Cin)
                                    + N * Ho * Wo * Cout)),
        )(h2_p, x_p, w3, params['sc3'], params['bi3'],
          w_ds, params['sc_ds'], params['bi_ds'])
    else:
        out = pl.pallas_call(
            k_tail_conv_bn_add_relu,
            grid=(N,),
            in_specs=[pl.BlockSpec((1, H, W, planes), lambda n: (n, 0, 0, 0)),
                      pl.BlockSpec((1, H, W, Cin), lambda n: (n, 0, 0, 0)),
                      pl.BlockSpec((planes, Cout), lambda n: (0, 0)),
                      pl.BlockSpec((1, Cout), lambda n: (0, 0)),
                      pl.BlockSpec((1, Cout), lambda n: (0, 0))],
            out_specs=pl.BlockSpec((1, H, W, Cout), lambda n: (n, 0, 0, 0)),
            out_shape=jax.ShapeDtypeStruct((N, H, W, Cout), jnp.float32),
            compiler_params=_cparams("parallel"),
            cost_estimate=pl.CostEstimate(
                flops=2 * N * H * W * planes * Cout, transcendentals=0,
                bytes_accessed=4 * (N * H * W * (planes + Cin + Cout))),
        )(h2, x, w3, params['sc3'], params['bi3'])

    return jnp.transpose(out, (0, 3, 1, 2))   # back to NCHW


# --------------------------- parameter init ------------------------------------

def init_params(key, inplanes, planes, stride):
    Cout = planes * EXPANSION
    ks = jax.random.split(key, 8)

    def conv_w(k, shape):   # PyTorch OIHW layout
        return jax.random.normal(k, shape, jnp.float32) * 0.1

    def bn_params(k, c):
        k1, k2, k3, k4 = jax.random.split(k, 4)
        gamma = jax.random.uniform(k1, (c,), jnp.float32, 0.5, 1.5)
        beta = jax.random.normal(k2, (c,), jnp.float32) * 0.1
        mean = jax.random.normal(k3, (c,), jnp.float32) * 0.1
        var = jax.random.uniform(k4, (c,), jnp.float32, 0.5, 1.5)
        return gamma, beta, mean, var

    torch_p = {
        'w1': conv_w(ks[0], (planes, inplanes, 1, 1)),
        'bn1': bn_params(ks[1], planes),
        'w2': conv_w(ks[2], (planes, planes, 3, 3)),
        'bn2': bn_params(ks[3], planes),
        'w3': conv_w(ks[4], (Cout, planes, 1, 1)),
        'bn3': bn_params(ks[5], Cout),
    }
    if stride > 1 or inplanes != Cout:
        torch_p['w_ds'] = conv_w(ks[6], (Cout, inplanes, 1, 1))
        torch_p['bn_ds'] = bn_params(ks[7], Cout)

    # convert to kernel layouts
    p = {}
    p['w1'] = jnp.transpose(torch_p['w1'][:, :, 0, 0], (1, 0))      # (Cin, planes)
    p['sc1'], p['bi1'] = _fold_bn(*torch_p['bn1'])
    p['w2'] = jnp.transpose(torch_p['w2'], (2, 3, 1, 0))            # (3,3,Cin,Cout)
    p['sc2'], p['bi2'] = _fold_bn(*torch_p['bn2'])
    p['w3'] = jnp.transpose(torch_p['w3'][:, :, 0, 0], (1, 0))      # (planes, Cout)
    p['sc3'], p['bi3'] = _fold_bn(*torch_p['bn3'])
    if 'w_ds' in torch_p:
        p['w_ds'] = jnp.transpose(torch_p['w_ds'][:, :, 0, 0], (1, 0))
        p['sc_ds'], p['bi_ds'] = _fold_bn(*torch_p['bn_ds'])
    return p, torch_p


# --------------------------- pure-JAX reference ---------------------------------

def ref_forward(x, tp, stride):
    def bn(z, g, b, m, v):
        return ((z - m[None, :, None, None]) / jnp.sqrt(v + EPS)[None, :, None, None]
                * g[None, :, None, None] + b[None, :, None, None])

    def conv(z, w, pad):
        return lax.conv_general_dilated(z, w, (1, 1), pad,
                                        dimension_numbers=('NCHW', 'OIHW', 'NCHW'))

    def avgpool(z, s):
        if s == 1:
            return z
        N, C, H, W = z.shape
        return z.reshape(N, C, H // s, s, W // s, s).mean(axis=(3, 5))

    out = jnp.maximum(bn(conv(x, tp['w1'], 'VALID'), *tp['bn1']), 0.0)
    out = jnp.maximum(bn(conv(out, tp['w2'], ((1, 1), (1, 1))), *tp['bn2']), 0.0)
    out = avgpool(out, stride)
    out = bn(conv(out, tp['w3'], 'VALID'), *tp['bn3'])
    if 'w_ds' in tp:
        identity = bn(conv(avgpool(x, stride), tp['w_ds'], 'VALID'), *tp['bn_ds'])
    else:
        identity = x
    return jnp.maximum(out + identity, 0.0)


# --------------------------- main -----------------------------------------------

if __name__ == "__main__":
    key = jax.random.PRNGKey(0)
    H = W = 16

    configs = [
        # (N, inplanes, planes, stride)
        (2, 4, 4, 2),    # exercises the fused downsample branch
        (2, 16, 4, 1),   # exercises the identity (no-downsample) branch
    ]

    for idx, (N, inplanes, planes, stride) in enumerate(configs):
        kx, kp = jax.random.split(jax.random.fold_in(key, idx))
        x = jax.random.normal(kx, (N, inplanes, H, W), jnp.float32)
        params, torch_params = init_params(kp, inplanes, planes, stride)

        ref = jax.block_until_ready(ref_forward(x, torch_params, stride))

        # fp32 path: tight tolerance.
        out = jax.block_until_ready(bottleneck_forward(x, params, stride))
        assert out.shape == (N, planes * EXPANSION, H // stride, W // stride), out.shape
        assert jnp.allclose(out, ref, rtol=1e-4, atol=1e-4), \
            float(jnp.max(jnp.abs(out - ref)))

        # bf16 MXU-operand path (f32 accumulate/epilogue): loose tolerance.
        out_bf = jax.block_until_ready(
            bottleneck_forward(x, params, stride, compute_dtype=jnp.bfloat16))
        assert jnp.allclose(out_bf, ref, rtol=1e-1, atol=1e-1), \
            float(jnp.max(jnp.abs(out_bf - ref)))

    print("KERNEL_OK")
</pallas_src>

<mosaic_0001>
module attributes {stable_mosaic.version = 11 : i64} {
  func.func @k_conv1x1_bn_relu(%arg0: i32, %arg1: memref<256x4xf32, #tpu.memory_space<vmem>>, %arg2: memref<4x4xf32, #tpu.memory_space<vmem>>, %arg3: memref<1x4xf32, #tpu.memory_space<vmem>>, %arg4: memref<1x4xf32, #tpu.memory_space<vmem>>, %arg5: memref<256x4xf32, #tpu.memory_space<vmem>>) attributes {dimension_semantics = [#tpu.dimension_semantics<parallel>], iteration_bounds = array<i64: 2>, scalar_prefetch = 0 : i64, scratch_operands = 0 : i64, tpu.core_type = #tpu.core_type<tc>, window_params = [{transform_indices = @transform_0, window_bounds = array<i64: 256, 4>}, {pipeline_mode = #tpu.pipeline_mode<synchronous>, transform_indices = @transform_1, window_bounds = array<i64: 4, 4>}, {pipeline_mode = #tpu.pipeline_mode<synchronous>, transform_indices = @transform_2, window_bounds = array<i64: 1, 4>}, {pipeline_mode = #tpu.pipeline_mode<synchronous>, transform_indices = @transform_3, window_bounds = array<i64: 1, 4>}, {transform_indices = @transform_4, window_bounds = array<i64: 256, 4>}]} {
    %c0 = arith.constant 0 : index
    %c0_0 = arith.constant 0 : index
    %0 = vector.load %arg1[%c0, %c0_0] : memref<256x4xf32, #tpu.memory_space<vmem>>, vector<256x4xf32>
    %c0_1 = arith.constant 0 : index
    %c0_2 = arith.constant 0 : index
    %1 = vector.load %arg2[%c0_1, %c0_2] : memref<4x4xf32, #tpu.memory_space<vmem>>, vector<4x4xf32>
    %cst = arith.constant dense<0.000000e+00> : vector<256x4xf32>
    %2 = tpu.matmul %0, %1, %cst {dimension_numbers = #tpu.dot_dimension_numbers<[1], [0], [0], [1], [0, 0, 1, 1], [], []>} : vector<256x4xf32>, vector<4x4xf32>, vector<256x4xf32> -> vector<256x4xf32>
    %c0_3 = arith.constant 0 : index
    %c0_4 = arith.constant 0 : index
    %3 = vector.load %arg3[%c0_3, %c0_4] : memref<1x4xf32, #tpu.memory_space<vmem>>, vector<1x4xf32>
    %4 = vector.broadcast %3 : vector<1x4xf32> to vector<256x4xf32>
    %5 = arith.mulf %2, %4 : vector<256x4xf32>
    %c0_5 = arith.constant 0 : index
    %c0_6 = arith.constant 0 : index
    %6 = vector.load %arg4[%c0_5, %c0_6] : memref<1x4xf32, #tpu.memory_space<vmem>>, vector<1x4xf32>
    %7 = vector.broadcast %6 : vector<1x4xf32> to vector<256x4xf32>
    %8 = arith.addf %5, %7 : vector<256x4xf32>
    %cst_7 = arith.constant 0.000000e+00 : f32
    %9 = vector.broadcast %cst_7 : f32 to vector<256x4xf32>
    %10 = arith.maximumf %8, %9 : vector<256x4xf32>
    %c0_8 = arith.constant 0 : index
    %c0_9 = arith.constant 0 : index
    %11 = vector.load %arg5[%c0_8, %c0_9] : memref<256x4xf32, #tpu.memory_space<vmem>>, vector<256x4xf32>
    tpu.vector_store %arg5[%c0_8, %c0_9], %10 {strides = array<i32>} : memref<256x4xf32, #tpu.memory_space<vmem>>, vector<256x4xf32>,
    return
  }
  func.func @transform_0(%arg0: i32) -> (i32, i32) {
    %c0_i32 = arith.constant 0 : i32
    %c0_i32_0 = arith.constant 0 : i32
    return %arg0, %c0_i32 : i32, i32
  }
  func.func @transform_1(%arg0: i32) -> (i32, i32) {
    %c0_i32 = arith.constant 0 : i32
    %c0_i32_0 = arith.constant 0 : i32
    %c0_i32_1 = arith.constant 0 : i32
    return %c0_i32, %c0_i32_0 : i32, i32
  }
  func.func @transform_2(%arg0: i32) -> (i32, i32) {
    %c0_i32 = arith.constant 0 : i32
    %c0_i32_0 = arith.constant 0 : i32
    %c0_i32_1 = arith.constant 0 : i32
    return %c0_i32, %c0_i32_0 : i32, i32
  }
  func.func @transform_3(%arg0: i32) -> (i32, i32) {
    %c0_i32 = arith.constant 0 : i32
    %c0_i32_0 = arith.constant 0 : i32
    %c0_i32_1 = arith.constant 0 : i32
    return %c0_i32, %c0_i32_0 : i32, i32
  }
  func.func @transform_4(%arg0: i32) -> (i32, i32) {
    %c0_i32 = arith.constant 0 : i32
    %c0_i32_0 = arith.constant 0 : i32
    return %arg0, %c0_i32 : i32, i32
  }
}

</mosaic_0001>

<bundles_post_ra>
// kernel: tpu_custom_call.1
= control target key start
LH: loop header
LB: loop body
LE: loop exit
PB: predicated region body
PF: predicated region fallthrough
CT: control target
= control target key end

     0   :  { %s930_s15 = smov 0   ;;  %s1163_s0 = inlined_call_operand.vmem [shape: f32[512,4], index: 0, kind: input, shape index: {}]   ;;  %s1164_s1 = inlined_call_operand.vmem [shape: f32[4,4], index: 1, kind: input, shape index: {}]   ;;  %s1165_s2 = inlined_call_operand.vmem [shape: f32[1,4], index: 2, kind: input, shape index: {}]   ;;  %s1166_s3 = inlined_call_operand.vmem [shape: f32[1,4], index: 3, kind: input, shape index: {}]   ;;  %s1167_s4 = inlined_call_operand.vmem [shape: f32[512,4], index: 4, kind: output, shape index: {}]  }
   0x1 LB: > { %s758_s16 = sadd.s32 4294967295, %s903_s15   ;;  %p762_p0 = scmp.ge.s32.totalorder %s903_s15, 1  ;;  %s903_s15 = sphi %s930_s15, %s14_s15  }
   0x2   : > { %p163_p1 = scmp.lt.s32.totalorder %s903_s15, 3 }
   0x4   : > { %p164_p2 = pnand %p762_p0, %p163_p1 }
   0x5   : > { %v233_v0 = vld [vmem:[%s1164_s1] sm:$0xf] (!%p164_p2)  ;;  %vm331_vm0 = vcmask (!%p164_p2), 1043456   ;;  %s763_s19 = sshll.u32 (!%p164_p2), %s758_s16, 5  ;;  %vm234_vm1 = vcmask (!%p164_p2), 31744  }
   0x6   : > { %167 = sbr.rel (%p164_p2) target bundleno = 267 (0x10b), region = 36  ;;  %837 = vmatprep.subr.msk.mxu0 (!%p164_p2), %vm331_vm0, %v233_v0  ;;  %887 = vmatprep.subr.msk.mxu1 (!%p164_p2), %vm331_vm0, %v233_v0  ;;  %p190_p3 = scmp.lt.s32.totalorder (!%p164_p2), %s763_s19, 63  ;;  %v1018_v33 = vld [vmem:[%s1165_s2] ss:$0 sm:$0xff] (!%p164_p2) }
   0x7   : > { %838 = vmatpush3.msk.msra.mxu0 (!%p164_p2), %vm331_vm0, %v233_v0  ;;  %888 = vmatpush3.msk.msra.mxu1 (!%p164_p2), %vm331_vm0, %v233_v0  ;;  %v1023_v35 = vld [vmem:[%s1166_s3] ss:$0 sm:$0xff] (!%p164_p2) }
   0xd   : > { %s1169_s19 = smov (!%p190_p3, %s763_s19), 63 }
   0xe   : > { %s764_s20 = sshll.u32 %s1169_s19, 3 }
   0xf   : > { %s949_s23 = scalar_lea.vmem %s1163_s0, %s764_s20  ;;  %s1036_s30 = scalar_lea.vmem %s1167_s4, %s764_s20 }
  0x10   : > { %v201_v1 = vld [vmem:[%s949_s23] sm:$0xff]  ;;  %v202_v3 = vld [vmem:[%s949_s23 + $0x8] sm:$0xff]  ;;  %v203_v5 = vld [vmem:[%s949_s23 + $0x10] sm:$0xff] }
  0x11   : > { %v217_v2 = vld [vmem:[%s949_s23 + $0x80] sm:$0xff]  ;;  %839 = vmatprep.mubr.msk.f32.mxu0 %vm234_vm1, %v201_v1  ;;  %v218_v4 = vld [vmem:[%s949_s23 + $0x88] sm:$0xff]  ;;  %v219_v6 = vld [vmem:[%s949_s23 + $0x90] sm:$0xff] }
  0x12   : > { %863 = vmatprep.mubr.msk.f32.mxu1 %vm234_vm1, %v217_v2  ;;  %840 = vmatmul.mubr.msk.f32.vlgmr.msra.gmra.mrb[0].mxu0 %vm234_vm1, %v202_v3  ;;  %v204_v7 = vld [vmem:[%s949_s23 + $0x18] sm:$0xff]  ;;  %v205_v9 = vld [vmem:[%s949_s23 + $0x20] sm:$0xff]  ;;  %v206_v11 = vld [vmem:[%s949_s23 + $0x28] sm:$0xff] }
  0x13   : > { %864 = vmatmul.mubr.msk.f32.vlgmr.msra.gmra.mrb[0].mxu1 %vm234_vm1, %v218_v4  ;;  %842 = vmatprep.mubr.msk.f32.mxu0 %vm234_vm1, %v203_v5  ;;  %v220_v8 = vld [vmem:[%s949_s23 + $0x98] sm:$0xff]  ;;  %v221_v10 = vld [vmem:[%s949_s23 + $0xa0] sm:$0xff]  ;;  %v222_v12 = vld [vmem:[%s949_s23 + $0xa8] sm:$0xff] }
  0x14   : > { %866 = vmatprep.mubr.msk.f32.mxu1 %vm234_vm1, %v219_v6  ;;  %v207_v13 = vld [vmem:[%s949_s23 + $0x30] sm:$0xff]  ;;  %v208_v15 = vld [vmem:[%s949_s23 + $0x38] sm:$0xff]  ;;  %v209_v17 = vld [vmem:[%s949_s23 + $0x40] sm:$0xff] }
  0x15   : > { %v223_v14 = vld [vmem:[%s949_s23 + $0xb0] sm:$0xff]  ;;  %v224_v16 = vld [vmem:[%s949_s23 + $0xb8] sm:$0xff]  ;;  %v225_v18 = vld [vmem:[%s949_s23 + $0xc0] sm:$0xff] }
  0x16   : > { %843 = vmatmul.mubr.msk.f32.gmra.mrb[2].mxu0 %vm234_vm1, %v204_v7  ;;  %v210_v19 = vld [vmem:[%s949_s23 + $0x48] sm:$0xff]  ;;  %v211_v21 = vld [vmem:[%s949_s23 + $0x50] sm:$0xff]  ;;  %v212_v23 = vld [vmem:[%s949_s23 + $0x58] sm:$0xff] }
  0x17   : > { %867 = vmatmul.mubr.msk.f32.gmra.mrb[2].mxu1 %vm234_vm1, %v220_v8  ;;  %845 = vmatprep.mubr.msk.f32.mxu0 %vm234_vm1, %v205_v9  ;;  %v226_v20 = vld [vmem:[%s949_s23 + $0xc8] sm:$0xff]  ;;  %v227_v22 = vld [vmem:[%s949_s23 + $0xd0] sm:$0xff]  ;;  %v228_v24 = vld [vmem:[%s949_s23 + $0xd8] sm:$0xff] }
  0x18   : > { %869 = vmatprep.mubr.msk.f32.mxu1 %vm234_vm1, %v221_v10  ;;  %v213_v25 = vld [vmem:[%s949_s23 + $0x60] sm:$0xff]  ;;  %v214_v27 = vld [vmem:[%s949_s23 + $0x68] sm:$0xff]  ;;  %v215_v29 = vld [vmem:[%s949_s23 + $0x70] sm:$0xff] }
  0x19   : > { %v229_v26 = vld [vmem:[%s949_s23 + $0xe0] sm:$0xff]  ;;  %v230_v28 = vld [vmem:[%s949_s23 + $0xe8] sm:$0xff]  ;;  %v231_v30 = vld [vmem:[%s949_s23 + $0xf0] sm:$0xff] }
  0x1a   : > { %846 = vmatmul.mubr.msk.f32.gmra.mrb[4].mxu0 %vm234_vm1, %v206_v11  ;;  %v216_v31 = vld [vmem:[%s949_s23 + $0x78] sm:$0xff] }
  0x1b   : > { %870 = vmatmul.mubr.msk.f32.gmra.mrb[4].mxu1 %vm234_vm1, %v222_v12  ;;  %848 = vmatprep.mubr.msk.f32.mxu0 %vm234_vm1, %v207_v13  ;;  %v232_v32 = vld [vmem:[%s949_s23 + $0xf8] sm:$0xff] }
  0x1c   : > { %872 = vmatprep.mubr.msk.f32.mxu1 %vm234_vm1, %v223_v14 }
  0x1e   : > { %849 = vmatmul.mubr.msk.f32.gmra.mrb[6].mxu0 %vm234_vm1, %v208_v15 }
  0x1f   : > { %873 = vmatmul.mubr.msk.f32.gmra.mrb[6].mxu1 %vm234_vm1, %v224_v16  ;;  %851 = vmatprep.mubr.msk.f32.mxu0 %vm234_vm1, %v209_v17 }
  0x20   : > { %875 = vmatprep.mubr.msk.f32.mxu1 %vm234_vm1, %v225_v18 }
  0x22   : > { %852 = vmatmul.mubr.msk.f32.gmra.mrb[8].mxu0 %vm234_vm1, %v210_v19 }
  0x23   : > { %876 = vmatmul.mubr.msk.f32.gmra.mrb[8].mxu1 %vm234_vm1, %v226_v20  ;;  %854 = vmatprep.mubr.msk.f32.mxu0 %vm234_vm1, %v211_v21 }
  0x24   : > { %878 = vmatprep.mubr.msk.f32.mxu1 %vm234_vm1, %v227_v22 }
  0x26   : > { %855 = vmatmul.mubr.msk.f32.gmra.mrb[10].mxu0 %vm234_vm1, %v212_v23 }
  0x27   : > { %879 = vmatmul.mubr.msk.f32.gmra.mrb[10].mxu1 %vm234_vm1, %v228_v24  ;;  %857 = vmatprep.mubr.msk.f32.mxu0 %vm234_vm1, %v213_v25 }
  0x28   : > { %881 = vmatprep.mubr.msk.f32.mxu1 %vm234_vm1, %v229_v26 }
  0x2a   : > { %858 = vmatmul.mubr.msk.f32.gmra.mrb[12].mxu0 %vm234_vm1, %v214_v27 }
  0x2b   : > { %882 = vmatmul.mubr.msk.f32.gmra.mrb[12].mxu1 %vm234_vm1, %v230_v28  ;;  %860 = vmatprep.mubr.msk.f32.mxu0 %vm234_vm1, %v215_v29 }
  0x2c   : > { %884 = vmatprep.mubr.msk.f32.mxu1 %vm234_vm1, %v231_v30 }
  0x2e   : > { %861 = vmatmul.mubr.msk.f32.gmra.mrb[14].mxu0 %vm234_vm1, %v216_v31 }
  0x2f   : > { %885 = vmatmul.mubr.msk.f32.gmra.mrb[14].mxu1 %vm234_vm1, %v232_v32 }
  0xe5   : > { %v841_v34 = vpop.f32.mrb[0].mxu0 }
  0xe6   : > { %v865_v36 = vpop.f32.mrb[0].mxu1  ;;  %v568_v37 = vmul.f32 %v841_v34, %v1018_v33  ;;  %v401_v39 = vpop.f32.mrb[1].mxu0 }
  0xe7   : > { %v584_v38 = vmul.f32 %v865_v36, %v1018_v33  ;;  %v481_v40 = vpop.f32.mrb[1].mxu1  ;;  %v567_v41 = vmul.f32 %v1018_v33, %v401_v39 }
  0xe8   : > { %v583_v42 = vmul.f32 %v1018_v33, %v481_v40  ;;  %v607_v43 = vadd.f32 %v1023_v35, %v568_v37 }
  0xe9   : > { %v623_v44 = vadd.f32 %v1023_v35, %v584_v38  ;;  %v606_v45 = vadd.f32 %v1023_v35, %v567_v41  ;;  %v844_v47 = vpop.f32.mrb[2].mxu0 }
  0xea   : > { %v622_v46 = vadd.f32 %v1023_v35, %v583_v42  ;;  %v868_v48 = vpop.f32.mrb[2].mxu1  ;;  %v639_v49 = vmax.f32 %v607_v43, 0.0  ;;  %v570_v51 = vmul.f32 %v844_v47, %v1018_v33  ;;  %v411_v53 = vpop.f32.mrb[3].mxu0 }
  0xeb   : > { %v655_v50 = vmax.f32 %v623_v44, 0.0  ;;  %v586_v52 = vmul.f32 %v868_v48, %v1018_v33  ;;  %v491_v54 = vpop.f32.mrb[3].mxu1  ;;  %v638_v55 = vmax.f32 %v606_v45, 0.0  ;;  %v569_v57 = vmul.f32 %v1018_v33, %v411_v53 }
  0xec   : > { %v654_v56 = vmax.f32 %v622_v46, 0.0  ;;  %v585_v58 = vmul.f32 %v1018_v33, %v491_v54  ;;  %671 = vst.msk [vmem:[%s1036_s30 + $0x8] sm:$0xff] %vm234_vm1, %v639_v49  ;;  %v609_v59 = vadd.f32 %v1023_v35, %v570_v51 }
  0xed   : > { %687 = vst.msk [vmem:[%s1036_s30 + $0x88] sm:$0xff] %vm234_vm1, %v655_v50  ;;  %v625_v60 = vadd.f32 %v1023_v35, %v586_v52  ;;  %670 = vst.msk [vmem:[%s1036_s30] sm:$0xff] %vm234_vm1, %v638_v55  ;;  %v608_v61 = vadd.f32 %v1023_v35, %v569_v57  ;;  %v847_v63 = vpop.f32.mrb[4].mxu0 }
  0xee   : > { %686 = vst.msk [vmem:[%s1036_s30 + $0x80] sm:$0xff] %vm234_vm1, %v654_v56  ;;  %v624_v62 = vadd.f32 %v1023_v35, %v585_v58  ;;  %v871_v0 = vpop.f32.mrb[4].mxu1  ;;  %v641_v1 = vmax.f32 %v609_v59, 0.0  ;;  %v572_v3 = vmul.f32 %v847_v63, %v1018_v33  ;;  %v421_v5 = vpop.f32.mrb[5].mxu0 }
  0xef   : > { %v657_v2 = vmax.f32 %v625_v60, 0.0  ;;  %v588_v4 = vmul.f32 %v871_v0, %v1018_v33  ;;  %v501_v6 = vpop.f32.mrb[5].mxu1  ;;  %v640_v7 = vmax.f32 %v608_v61, 0.0  ;;  %v571_v9 = vmul.f32 %v1018_v33, %v421_v5 }
  0xf0   : > { %v656_v8 = vmax.f32 %v624_v62, 0.0  ;;  %v587_v10 = vmul.f32 %v1018_v33, %v501_v6  ;;  %673 = vst.msk [vmem:[%s1036_s30 + $0x18] sm:$0xff] %vm234_vm1, %v641_v1  ;;  %v611_v11 = vadd.f32 %v1023_v35, %v572_v3 }
  0xf1   : > { %689 = vst.msk [vmem:[%s1036_s30 + $0x98] sm:$0xff] %vm234_vm1, %v657_v2  ;;  %v627_v12 = vadd.f32 %v1023_v35, %v588_v4  ;;  %672 = vst.msk [vmem:[%s1036_s30 + $0x10] sm:$0xff] %vm234_vm1, %v640_v7  ;;  %v610_v13 = vadd.f32 %v1023_v35, %v571_v9  ;;  %v850_v15 = vpop.f32.mrb[6].mxu0 }
  0xf2   : > { %688 = vst.msk [vmem:[%s1036_s30 + $0x90] sm:$0xff] %vm234_vm1, %v656_v8  ;;  %v626_v14 = vadd.f32 %v1023_v35, %v587_v10  ;;  %v874_v16 = vpop.f32.mrb[6].mxu1  ;;  %v643_v17 = vmax.f32 %v611_v11, 0.0  ;;  %v574_v19 = vmul.f32 %v850_v15, %v1018_v33  ;;  %v431_v21 = vpop.f32.mrb[7].mxu0 }
  0xf3   : > { %v659_v18 = vmax.f32 %v627_v12, 0.0  ;;  %v590_v20 = vmul.f32 %v874_v16, %v1018_v33  ;;  %v511_v22 = vpop.f32.mrb[7].mxu1  ;;  %v642_v23 = vmax.f32 %v610_v13, 0.0  ;;  %v573_v25 = vmul.f32 %v1018_v33, %v431_v21 }
  0xf4   : > { %v658_v24 = vmax.f32 %v626_v14, 0.0  ;;  %v589_v26 = vmul.f32 %v1018_v33, %v511_v22  ;;  %675 = vst.msk [vmem:[%s1036_s30 + $0x28] sm:$0xff] %vm234_vm1, %v643_v17  ;;  %v613_v27 = vadd.f32 %v1023_v35, %v574_v19 }
  0xf5   : > { %691 = vst.msk [vmem:[%s1036_s30 + $0xa8] sm:$0xff] %vm234_vm1, %v659_v18  ;;  %v629_v28 = vadd.f32 %v1023_v35, %v590_v20  ;;  %674 = vst.msk [vmem:[%s1036_s30 + $0x20] sm:$0xff] %vm234_vm1, %v642_v23  ;;  %v612_v29 = vadd.f32 %v1023_v35, %v573_v25  ;;  %v853_v31 = vpop.f32.mrb[8].mxu0 }
  0xf6   : > { %690 = vst.msk [vmem:[%s1036_s30 + $0xa0] sm:$0xff] %vm234_vm1, %v658_v24  ;;  %v628_v30 = vadd.f32 %v1023_v35, %v589_v26  ;;  %v877_v32 = vpop.f32.mrb[8].mxu1  ;;  %v645_v34 = vmax.f32 %v613_v27, 0.0  ;;  %v576_v37 = vmul.f32 %v853_v31, %v1018_v33  ;;  %v441_v39 = vpop.f32.mrb[9].mxu0 }
  0xf7   : > { %v661_v36 = vmax.f32 %v629_v28, 0.0  ;;  %v592_v38 = vmul.f32 %v877_v32, %v1018_v33  ;;  %v521_v40 = vpop.f32.mrb[9].mxu1  ;;  %v644_v41 = vmax.f32 %v612_v29, 0.0  ;;  %v575_v43 = vmul.f32 %v1018_v33, %v441_v39 }
  0xf8   : > { %v660_v42 = vmax.f32 %v628_v30, 0.0  ;;  %v591_v44 = vmul.f32 %v1018_v33, %v521_v40  ;;  %677 = vst.msk [vmem:[%s1036_s30 + $0x38] sm:$0xff] %vm234_vm1, %v645_v34  ;;  %v615_v45 = vadd.f32 %v1023_v35, %v576_v37 }
  0xf9   : > { %693 = vst.msk [vmem:[%s1036_s30 + $0xb8] sm:$0xff] %vm234_vm1, %v661_v36  ;;  %v631_v46 = vadd.f32 %v1023_v35, %v592_v38  ;;  %676 = vst.msk [vmem:[%s1036_s30 + $0x30] sm:$0xff] %vm234_vm1, %v644_v41  ;;  %v614_v47 = vadd.f32 %v1023_v35, %v575_v43  ;;  %v856_v49 = vpop.f32.mrb[10].mxu0 }
  0xfa   : > { %692 = vst.msk [vmem:[%s1036_s30 + $0xb0] sm:$0xff] %vm234_vm1, %v660_v42  ;;  %v630_v48 = vadd.f32 %v1023_v35, %v591_v44  ;;  %v880_v50 = vpop.f32.mrb[10].mxu1  ;;  %v647_v51 = vmax.f32 %v615_v45, 0.0  ;;  %v578_v53 = vmul.f32 %v856_v49, %v1018_v33  ;;  %v451_v55 = vpop.f32.mrb[11].mxu0 }
  0xfb   : > { %v663_v52 = vmax.f32 %v631_v46, 0.0  ;;  %v594_v54 = vmul.f32 %v880_v50, %v1018_v33  ;;  %v531_v56 = vpop.f32.mrb[11].mxu1  ;;  %v646_v57 = vmax.f32 %v614_v47, 0.0  ;;  %v577_v59 = vmul.f32 %v1018_v33, %v451_v55 }
  0xfc   : > { %v662_v58 = vmax.f32 %v630_v48, 0.0  ;;  %v593_v60 = vmul.f32 %v1018_v33, %v531_v56  ;;  %679 = vst.msk [vmem:[%s1036_s30 + $0x48] sm:$0xff] %vm234_vm1, %v647_v51  ;;  %v617_v61 = vadd.f32 %v1023_v35, %v578_v53 }
  0xfd   : > { %695 = vst.msk [vmem:[%s1036_s30 + $0xc8] sm:$0xff] %vm234_vm1, %v663_v52  ;;  %v633_v62 = vadd.f32 %v1023_v35, %v594_v54  ;;  %678 = vst.msk [vmem:[%s1036_s30 + $0x40] sm:$0xff] %vm234_vm1, %v646_v57  ;;  %v616_v63 = vadd.f32 %v1023_v35, %v577_v59  ;;  %v859_v1 = vpop.f32.mrb[12].mxu0 }
  0xfe   : > { %694 = vst.msk [vmem:[%s1036_s30 + $0xc0] sm:$0xff] %vm234_vm1, %v662_v58  ;;  %v632_v0 = vadd.f32 %v1023_v35, %v593_v60  ;;  %v883_v2 = vpop.f32.mrb[12].mxu1  ;;  %v649_v3 = vmax.f32 %v617_v61, 0.0  ;;  %v580_v5 = vmul.f32 %v859_v1, %v1018_v33  ;;  %v461_v7 = vpop.f32.mrb[13].mxu0 }
  0xff   : > { %v665_v4 = vmax.f32 %v633_v62, 0.0  ;;  %v596_v6 = vmul.f32 %v883_v2, %v1018_v33  ;;  %v541_v8 = vpop.f32.mrb[13].mxu1  ;;  %v648_v9 = vmax.f32 %v616_v63, 0.0  ;;  %v579_v11 = vmul.f32 %v1018_v33, %v461_v7 }
 0x100   : > { %v664_v10 = vmax.f32 %v632_v0, 0.0  ;;  %v595_v12 = vmul.f32 %v1018_v33, %v541_v8  ;;  %681 = vst.msk [vmem:[%s1036_s30 + $0x58] sm:$0xff] %vm234_vm1, %v649_v3  ;;  %v619_v13 = vadd.f32 %v1023_v35, %v580_v5 }
 0x101   : > { %697 = vst.msk [vmem:[%s1036_s30 + $0xd8] sm:$0xff] %vm234_vm1, %v665_v4  ;;  %v635_v14 = vadd.f32 %v1023_v35, %v596_v6  ;;  %680 = vst.msk [vmem:[%s1036_s30 + $0x50] sm:$0xff] %vm234_vm1, %v648_v9  ;;  %v618_v15 = vadd.f32 %v1023_v35, %v579_v11  ;;  %v862_v17 = vpop.f32.mrb[14].mxu0 }
 0x102   : > { %696 = vst.msk [vmem:[%s1036_s30 + $0xd0] sm:$0xff] %vm234_vm1, %v664_v10  ;;  %v634_v16 = vadd.f32 %v1023_v35, %v595_v12  ;;  %v886_v18 = vpop.f32.mrb[14].mxu1  ;;  %v651_v19 = vmax.f32 %v619_v13, 0.0  ;;  %v582_v21 = vmul.f32 %v862_v17, %v1018_v33  ;;  %v471_v23 = vpop.f32.mrb[15].mxu0 }
 0x103   : > { %v667_v20 = vmax.f32 %v635_v14, 0.0  ;;  %v598_v22 = vmul.f32 %v886_v18, %v1018_v33  ;;  %v551_v24 = vpop.f32.mrb[15].mxu1  ;;  %v650_v25 = vmax.f32 %v618_v15, 0.0  ;;  %v581_v27 = vmul.f32 %v1018_v33, %v471_v23 }
 0x104   : > { %v666_v26 = vmax.f32 %v634_v16, 0.0  ;;  %v597_v28 = vmul.f32 %v1018_v33, %v551_v24  ;;  %683 = vst.msk [vmem:[%s1036_s30 + $0x68] sm:$0xff] %vm234_vm1, %v651_v19  ;;  %v621_v29 = vadd.f32 %v1023_v35, %v582_v21 }
 0x105   : > { %699 = vst.msk [vmem:[%s1036_s30 + $0xe8] sm:$0xff] %vm234_vm1, %v667_v20  ;;  %v637_v30 = vadd.f32 %v1023_v35, %v598_v22  ;;  %682 = vst.msk [vmem:[%s1036_s30 + $0x60] sm:$0xff] %vm234_vm1, %v650_v25  ;;  %v620_v31 = vadd.f32 %v1023_v35, %v581_v27 }
 0x106   : > { %698 = vst.msk [vmem:[%s1036_s30 + $0xe0] sm:$0xff] %vm234_vm1, %v666_v26  ;;  %v636_v32 = vadd.f32 %v1023_v35, %v597_v28  ;;  %v653_v34 = vmax.f32 %v621_v29, 0.0 }
 0x107   : > { %v669_v36 = vmax.f32 %v637_v30, 0.0  ;;  %v652_v33 = vmax.f32 %v620_v31, 0.0 }
 0x108   : > { %v668_v37 = vmax.f32 %v636_v32, 0.0  ;;  %685 = vst.msk [vmem:[%s1036_s30 + $0x78] sm:$0xff] %vm234_vm1, %v653_v34 }
 0x109   : > { %701 = vst.msk [vmem:[%s1036_s30 + $0xf8] sm:$0xff] %vm234_vm1, %v669_v36  ;;  %684 = vst.msk [vmem:[%s1036_s30 + $0x70] sm:$0xff] %vm234_vm1, %v652_v33 }
 0x10a   : > { %700 = vst.msk [vmem:[%s1036_s30 + $0xf0] sm:$0xff] %vm234_vm1, %v668_v37 }
 0x10b PF: > { %s14_s15 = sadd.s32 1, %s903_s15  }
 0x10c   : > { %p11_p4 = scmp.ge.s32.totalorder %s14_s15, 4  }
 0x10e   :  { %13 = sbr.rel (!%p11_p4) target bundleno = 1 (0x1), region = 66 }

</bundles_post_ra>
